<compile_context>
chip_gen: v6e
topology: v6e:2x2x1
jax: 0.10.0
libtpu: 0.0.40
codegen_flags: <defaults>
</compile_context>

<pallas_src>
import numpy as np

import jax
import jax.numpy as jnp
from jax.experimental import pallas as pl
from jax.experimental.pallas import tpu as pltpu

NUM_EMBEDDINGS = 50  # nn.Embedding(50, num_pos_feats)

# Only split the two channel halves across grid steps (v7x 2-TC megacore)
# when each half is big enough to beat ~0.35 us/step fixed grid overhead.
_SPLIT_MIN_ELEMS = 512 * 1024


def _kernel_fused(lhs_ref, sel_ref, out_ref):
    """Single-step kernel: out (2F, H*W) = block-diag([colW, rowH]) @ selector.

    One MXU matmul + one dense, lane-aligned store of the whole slab; no
    per-row masked sub-stores, no cross-lane broadcasts.
    """
    out_ref[...] = jnp.dot(
        lhs_ref[...], sel_ref[...],
        preferred_element_type=jnp.float32).astype(out_ref.dtype)


def _kernel_split(colW_ref, rowH_ref, scol_ref, srow_ref, out_ref):
    """Two-step kernel (one channel half per grid step, 'parallel' on v7x)."""
    g = pl.program_id(0)

    @pl.when(g == 0)
    def _():
        out_ref[...] = jnp.dot(
            colW_ref[...], scol_ref[...],
            preferred_element_type=jnp.float32).astype(out_ref.dtype)

    @pl.when(g == 1)
    def _():
        out_ref[...] = jnp.dot(
            rowH_ref[...], srow_ref[...],
            preferred_element_type=jnp.float32).astype(out_ref.dtype)


def _selector_np(H, W):
    """0/1 selector S of shape (W+H, H*W):
       S[x,     y*W + x'] = 1 iff x == x'   (col half: tile colW across H)
       S[W + h, y*W + x ] = 1 iff h == y    (row half: broadcast rowH across W)
    """
    HW = H * W
    cols = np.arange(HW)
    s = np.zeros((W + H, HW), dtype=np.float32)
    s[cols % W, cols] = 1.0
    s[W + cols // W, cols] = 1.0
    return s


def position_embedding_learned(x, col_embed, row_embed, *, out_dtype=None,
                               expand_batch=True):
    """x: (B, C, H, W); col_embed/row_embed: (50, F).

    Returns (B, 2F, H, W) when expand_batch=True (exact PyTorch semantics),
    or a broadcastable (1, 2F, H, W) slab when expand_batch=False (preferred:
    avoids materializing B identical copies in HBM).
    """
    B = x.shape[0]
    H, W = x.shape[-2], x.shape[-1]
    n_emb, F = col_embed.shape
    assert col_embed.shape == row_embed.shape, (
        "col/row embedding tables must have the same shape")
    assert H <= n_emb and W <= n_emb, "H, W must be <= 50"

    if out_dtype is None:
        out_dtype = col_embed.dtype
    out_dtype = jnp.dtype(out_dtype)
    emb_dtype = col_embed.dtype
    HW = H * W

    # One-time, tiny transposes in the wrapper (no in-kernel XLU work).
    colW = jnp.transpose(col_embed[:W])   # (F, W)
    rowH = jnp.transpose(row_embed[:H])   # (F, H)

    s_np = _selector_np(H, W)             # (W+H, HW) 0/1, baked constant

    # Packed sublane tile for the output dtype: 8 (f32) / 16 (bf16) / 32 (i8).
    itemsize = out_dtype.itemsize
    sublane = max(8, 32 // itemsize)
    use_split = (F * HW >= _SPLIT_MIN_ELEMS) and (F % sublane == 0)

    io_bytes = (2 * F * HW * itemsize
                + (2 * F * (W + H) + (W + H) * HW) * jnp.dtype(emb_dtype).itemsize)
    cost = pl.CostEstimate(flops=2 * 2 * F * (W + H) * HW,
                           transcendentals=0,
                           bytes_accessed=io_bytes)

    if use_split:
        s_col = jnp.asarray(s_np[:W], dtype=emb_dtype)   # (W, HW)
        s_row = jnp.asarray(s_np[W:], dtype=emb_dtype)   # (H, HW)
        slab = pl.pallas_call(
            _kernel_split,
            out_shape=jax.ShapeDtypeStruct((2 * F, HW), out_dtype),
            grid_spec=pltpu.PrefetchScalarGridSpec(
                num_scalar_prefetch=0,
                grid=(2,),  # one channel half per step; independent halves
                in_specs=[
                    pl.BlockSpec((F, W), lambda g: (0, 0)),
                    pl.BlockSpec((F, H), lambda g: (0, 0)),
                    pl.BlockSpec((W, HW), lambda g: (0, 0)),
                    pl.BlockSpec((H, HW), lambda g: (0, 0)),
                ],
                out_specs=pl.BlockSpec((F, HW), lambda g: (g, 0)),
            ),
            compiler_params=pltpu.CompilerParams(
                dimension_semantics=("parallel",)),
            cost_estimate=cost,
        )(colW, rowH, s_col, s_row)
    else:
        # Block-diagonal lhs [[colW, 0], [0, rowH]] -> one dot, one dense store.
        lhs = jnp.concatenate(
            [jnp.concatenate([colW, jnp.zeros((F, H), emb_dtype)], axis=1),
             jnp.concatenate([jnp.zeros((F, W), emb_dtype), rowH], axis=1)],
            axis=0)                                        # (2F, W+H)
        sel = jnp.asarray(s_np, dtype=emb_dtype)           # (W+H, HW)
        slab = pl.pallas_call(
            _kernel_fused,
            out_shape=jax.ShapeDtypeStruct((2 * F, HW), out_dtype),
            cost_estimate=cost,
        )(lhs, sel)

    # Free metadata reshape back to NCHW.
    pos = slab.reshape(1, 2 * F, H, W)
    if expand_batch:
        # Matches the PyTorch .repeat(B, 1, 1, 1); fuses under jit when the
        # consumer accepts a broadcast.  Prefer expand_batch=False to avoid
        # B-way HBM writeback when the consumer can broadcast itself.
        pos = jnp.broadcast_to(pos, (B, 2 * F, H, W))
    return pos


def _reference(x, col_embed, row_embed):
    """Pure-JAX reference matching the PyTorch forward."""
    B, _, H, W = x.shape
    x_emb = col_embed[:W]                                # (W, F)
    y_emb = row_embed[:H]                                # (H, F)
    pos = jnp.concatenate(
        [jnp.broadcast_to(x_emb[None, :, :], (H, W, x_emb.shape[-1])),
         jnp.broadcast_to(y_emb[:, None, :], (H, W, y_emb.shape[-1]))],
        axis=-1)                                         # (H, W, 2F)
    pos = jnp.transpose(pos, (2, 0, 1))[None]            # (1, 2F, H, W)
    return jnp.broadcast_to(pos, (B,) + pos.shape[1:])


if __name__ == "__main__":
    key = jax.random.PRNGKey(0)
    k_x, k_col, k_row, k_x2, k_col2, k_row2 = jax.random.split(key, 6)

    # --- small case: single-step fused path (exact PyTorch output shape) ---
    B, C, H, W = 2, 4, 16, 16
    F = 32  # num_pos_feats (small for the demo)
    x = jax.random.normal(k_x, (B, C, H, W), dtype=jnp.float32)
    # nn.init.uniform_ -> U[0, 1)
    col_embed = jax.random.uniform(k_col, (NUM_EMBEDDINGS, F), dtype=jnp.float32)
    row_embed = jax.random.uniform(k_row, (NUM_EMBEDDINGS, F), dtype=jnp.float32)

    pos = jax.block_until_ready(
        position_embedding_learned(x, col_embed, row_embed))
    ref = _reference(x, col_embed, row_embed)
    assert pos.shape == (B, 2 * F, H, W), pos.shape
    assert jnp.allclose(pos, ref), "fused-path mismatch vs reference"

    # --- larger case: exercises the 2-step 'parallel' path (v7x megacore),
    #     returned as the un-materialized (1, 2F, H, W) slab ---
    B2, C2, H2, W2, F2 = 2, 4, 46, 46, 256
    x2 = jax.random.normal(k_x2, (B2, C2, H2, W2), dtype=jnp.float32)
    col2 = jax.random.uniform(k_col2, (NUM_EMBEDDINGS, F2), dtype=jnp.float32)
    row2 = jax.random.uniform(k_row2, (NUM_EMBEDDINGS, F2), dtype=jnp.float32)
    pos2 = jax.block_until_ready(
        position_embedding_learned(x2, col2, row2, expand_batch=False))
    ref2 = _reference(x2, col2, row2)
    assert pos2.shape == (1, 2 * F2, H2, W2), pos2.shape
    assert jnp.allclose(pos2, ref2[:1]), "split-path mismatch vs reference"

    print("KERNEL_OK")
</pallas_src>

<mosaic_0001>
module attributes {stable_mosaic.version = 11 : i64} {
  func.func @_kernel_fused(%arg0: memref<64x32xf32, #tpu.memory_space<vmem>>, %arg1: memref<32x256xf32, #tpu.memory_space<vmem>>, %arg2: memref<64x256xf32, #tpu.memory_space<vmem>>) attributes {dimension_semantics = [], scalar_prefetch = 0 : i64, scratch_operands = 0 : i64, tpu.core_type = #tpu.core_type<tc>} {
    %c0 = arith.constant 0 : index
    %c0_0 = arith.constant 0 : index
    %0 = vector.load %arg0[%c0, %c0_0] : memref<64x32xf32, #tpu.memory_space<vmem>>, vector<64x32xf32>
    %c0_1 = arith.constant 0 : index
    %c0_2 = arith.constant 0 : index
    %1 = vector.load %arg1[%c0_1, %c0_2] : memref<32x256xf32, #tpu.memory_space<vmem>>, vector<32x256xf32>
    %cst = arith.constant dense<0.000000e+00> : vector<64x256xf32>
    %2 = tpu.matmul %0, %1, %cst {dimension_numbers = #tpu.dot_dimension_numbers<[1], [0], [0], [1], [0, 0, 1, 1], [], []>} : vector<64x32xf32>, vector<32x256xf32>, vector<64x256xf32> -> vector<64x256xf32>
    %c0_3 = arith.constant 0 : index
    %c0_4 = arith.constant 0 : index
    %3 = vector.load %arg2[%c0_3, %c0_4] : memref<64x256xf32, #tpu.memory_space<vmem>>, vector<64x256xf32>
    tpu.vector_store %arg2[%c0_3, %c0_4], %2 {strides = array<i32>} : memref<64x256xf32, #tpu.memory_space<vmem>>, vector<64x256xf32>,
    return
  }
}

</mosaic_0001>

<bundles_post_ra>
// kernel: tpu_custom_call.1
= control target key start
LH: loop header
LB: loop body
LE: loop exit
PB: predicated region body
PF: predicated region fallthrough
CT: control target
= control target key end

     0   :  { %s318_s0 = inlined_call_operand.vmem [shape: f32[64,32], index: 0, kind: input, shape index: {}]   ;;  %s319_s1 = inlined_call_operand.vmem [shape: f32[32,256], index: 1, kind: input, shape index: {}]   ;;  %s320_s2 = inlined_call_operand.hbm [shape: f32[64,256], index: 2, kind: output, shape index: {}]  }
   0x1   :  { %v27_v0 = vld [vmem:[%s319_s1 + $0x38] sm:$0xff]  ;;  %v26_v1 = vld [vmem:[%s319_s1 + $0x30] sm:$0xff]  ;;  %v25_v2 = vld [vmem:[%s319_s1 + $0x28] sm:$0xff] }
   0x2   :  { %77 = vmatprep.subr.mxu0 %v27_v0  ;;  %206 = vmatprep.subr.mxu1 %v27_v0  ;;  %v24_v3 = vld [vmem:[%s319_s1 + $0x20] sm:$0xff]  ;;  %v23_v4 = vld [vmem:[%s319_s1 + $0x18] sm:$0xff]  ;;  %v22_v5 = vld [vmem:[%s319_s1 + $0x10] sm:$0xff] }
   0x3   :  { %78 = vmatpush1.msra.mxu0 %v26_v1  ;;  %210 = vmatpush1.msra.mxu1 %v26_v1  ;;  %v21_v6 = vld [vmem:[%s319_s1 + $0x8] sm:$0xff]  ;;  %v20_v7 = vld [vmem:[%s319_s1] sm:$0xff] }
   0x4   :  { %79 = vmatprep.subr.mxu0 %v25_v2  ;;  %207 = vmatprep.subr.mxu1 %v25_v2 }
   0x5   :  { %80 = vmatpush1.msra.mxu0 %v24_v3  ;;  %211 = vmatpush1.msra.mxu1 %v24_v3 }
   0x6   :  { %81 = vmatprep.subr.mxu0 %v23_v4  ;;  %208 = vmatprep.subr.mxu1 %v23_v4 }
   0x7   :  { %7 = vsyncpa [#allocation3], 0  ;;  %82 = vmatpush1.msra.mxu0 %v22_v5  ;;  %212 = vmatpush1.msra.mxu1 %v22_v5  ;;  %v12_v8 = vld [vmem:[%s318_s0] sm:$0xff]  ;;  %vm28_vm0 = vcmask 261120   ;;  %v240_v10 = vmov 0.0   ;;  %v13_v11 = vld [vmem:[%s318_s0 + $0x8] sm:$0xff] }
   0x8   :  { %83 = vmatprep.subr.mxu0 %v21_v6  ;;  %209 = vmatprep.subr.mxu1 %v21_v6  ;;  %v16_v9 = vld [vmem:[%s318_s0 + $0x20] sm:$0xff]  ;;  %v17_v12 = vld [vmem:[%s318_s0 + $0x28] sm:$0xff]  ;;  %v14_v13 = vld [vmem:[%s318_s0 + $0x10] sm:$0xff] }
   0x9   :  { %84 = vmatpush1.msra.mxu0 %v20_v7  ;;  %213 = vmatpush1.msra.mxu1 %v20_v7  ;;  %v18_v14 = vld [vmem:[%s318_s0 + $0x30] sm:$0xff]  ;;  %v15_v15 = vld [vmem:[%s318_s0 + $0x18] sm:$0xff] }
   0xa   :  { %117 = vmatprep.mubr.f32.mxu0 %v240_v10  ;;  %141 = vmatprep.mubr.f32.mxu1 %v240_v10  ;;  %v19_v16 = vld [vmem:[%s318_s0 + $0x38] sm:$0xff]  ;;  %s241_s0 = smov [#allocation2]  }
   0xb   :  { %198 = vmatmul.mubr.msk.f32.vlgmr.msra.gmra.mxu0 %vm28_vm0, %v12_v8  ;;  %202 = vmatmul.mubr.msk.f32.vlgmr.msra.gmra.mxu1 %vm28_vm0, %v16_v9  ;;  %s187_s12 = sshll.u32 %s241_s0, 4  ;;  %s188_s12 = int_to_ptr.vmem [resolvable:$true] %s187_s12 }
   0xc   :  { %123 = vmatprep.mubr.f32.mxu0 %v240_v10  ;;  %147 = vmatprep.mubr.f32.mxu1 %v240_v10  ;;  %s218_s13 = scalar_lea.vmem %s188_s12, 2048  ;;  %p223_p1 = scmp.lt.s32.totalorder %s188_s12, %s188_s12 }
   0xd   :  { %p219_p0 = scmp.ne.s32.totalorder %s188_s12, %s218_s13  ;;  %p224_p2 = scmp.lt.s32.totalorder %s218_s13, %s218_s13 }
   0xf   :  { %199 = vmatmul.mubr.msk.f32.gmra.mxu0 %vm28_vm0, %v13_v11  ;;  %203 = vmatmul.mubr.msk.f32.gmra.mxu1 %vm28_vm0, %v17_v12  ;;  %p225_p3 = por %p224_p2, %p223_p1 }
  0x10   :  { %129 = vmatprep.mubr.f32.mxu0 %v240_v10  ;;  %153 = vmatprep.mubr.f32.mxu1 %v240_v10 }
  0x11   :  { %p226_p4 = pnand %p225_p3, %p219_p0 }
  0x13   :  { %200 = vmatmul.mubr.msk.f32.gmra.mxu0 %vm28_vm0, %v14_v13  ;;  %204 = vmatmul.mubr.msk.f32.gmra.mxu1 %vm28_vm0, %v18_v14 }
  0x14   :  { %135 = vmatprep.mubr.f32.mxu0 %v240_v10  ;;  %159 = vmatprep.mubr.f32.mxu1 %v240_v10 }
  0x17   :  { %201 = vmatmul.mubr.msk.f32.gmra.mxu0 %vm28_vm0, %v15_v15  ;;  %205 = vmatmul.mubr.msk.f32.gmra.mxu1 %vm28_vm0, %v19_v16 }
  0xcb   :  { %v119_v17 = vpop.f32.mrf.mxu0  ;;  %v143_v18 = vpop.f32.mrf.mxu1 }
  0xcc   :  { %166 = vst [vmem:[#allocation2] sm:$0xff] %v119_v17  ;;  %174 = vst [vmem:[#allocation2 + $0x40] sm:$0xff] %v143_v18 }
  0xcd   :  { %v121_v19 = vpop.f32.mrf.mxu0  ;;  %v145_v20 = vpop.f32.mrf.mxu1 }
  0xce   :  { %167 = vst [vmem:[#allocation2 + $0x8] sm:$0xff] %v121_v19  ;;  %175 = vst [vmem:[#allocation2 + $0x48] sm:$0xff] %v145_v20 }
  0xcf   :  { %v125_v21 = vpop.f32.mrf.mxu0  ;;  %v149_v22 = vpop.f32.mrf.mxu1 }
  0xd0   :  { %168 = vst [vmem:[#allocation2 + $0x10] sm:$0xff] %v125_v21  ;;  %176 = vst [vmem:[#allocation2 + $0x50] sm:$0xff] %v149_v22 }
  0xd1   :  { %v127_v23 = vpop.f32.mrf.mxu0  ;;  %v151_v24 = vpop.f32.mrf.mxu1 }
  0xd2   :  { %169 = vst [vmem:[#allocation2 + $0x18] sm:$0xff] %v127_v23  ;;  %177 = vst [vmem:[#allocation2 + $0x58] sm:$0xff] %v151_v24 }
  0xd3   :  { %v131_v25 = vpop.f32.mrf.mxu0  ;;  %v155_v26 = vpop.f32.mrf.mxu1 }
  0xd4   :  { %170 = vst [vmem:[#allocation2 + $0x20] sm:$0xff] %v131_v25  ;;  %178 = vst [vmem:[#allocation2 + $0x60] sm:$0xff] %v155_v26 }
  0xd5   :  { %v133_v27 = vpop.f32.mrf.mxu0  ;;  %v157_v28 = vpop.f32.mrf.mxu1 }
  0xd6   :  { %171 = vst [vmem:[#allocation2 + $0x28] sm:$0xff] %v133_v27  ;;  %179 = vst [vmem:[#allocation2 + $0x68] sm:$0xff] %v157_v28 }
  0xd7   :  { %v137_v29 = vpop.f32.mrf.mxu0  ;;  %v161_v30 = vpop.f32.mrf.mxu1 }
  0xd8   :  { %172 = vst [vmem:[#allocation2 + $0x30] sm:$0xff] %v137_v29  ;;  %180 = vst [vmem:[#allocation2 + $0x70] sm:$0xff] %v161_v30 }
  0xd9   :  { %v139_v31 = vpop.f32.mrf.mxu0  ;;  %v163_v32 = vpop.f32.mrf.mxu1 }
  0xda   :  { %173 = vst [vmem:[#allocation2 + $0x38] sm:$0xff] %v139_v31  ;;  %181 = vst [vmem:[#allocation2 + $0x78] sm:$0xff] %v163_v32 }
  0xdb   :  { %229 = shalt.err (!%p226_p4)
}
  0xdc   :  { %s242_s14 = smov 256   ;;  %s243_s15 = smov 16  }
  0xdd   :  { %193 = dma.vmem_to_hbm [thread:$0]  %s188_s12, 2048, %s320_s2, [#allocation3], %s242_s14, %s242_s14, %s243_s15  }
  0xde   :  { %238 = dma.done.wait [#allocation3], 2048  }
  0xdf   :  { %239 = vsyncadd [#allocation3], 4294965248 }
  0xe0   :  { %197 = vsyncpa [#allocation3], 1 }

</bundles_post_ra>
